<compile_context>
chip_gen: v6e
topology: v6e:2x2x1
jax: 0.10.0
libtpu: 0.0.40
codegen_flags: <defaults>
</compile_context>

<pallas_src>
import functools

import jax
import jax.numpy as jnp
from jax import lax
from jax.experimental import pallas as pl
from jax.experimental.pallas import tpu as pltpu

LOG_MIN = -20.0
LOG_MAX = 2.0
_NUM_MM = 4  # 3 trunk Linear+ReLU layers + 1 fused [mean|log_std] head


def _round_up(x, m):
    return (x + m - 1) // m * m


def _actor_kernel(x_ref, w_ref, b_ref, out_ref, *, a_dim):
    """One batch tile of the Actor forward.

    x_ref   : (TILE_B, P)     f32 zero-padded states
    w_ref   : (4, P, P)       param dtype; layer 3 = fused [wm | ws | 0...]
    b_ref   : (4, 1, P)       f32 biases, same packing
    out_ref : (TILE_B, P)     f32; cols [0:a_dim]=mean, [a_dim:2a_dim]=clamped log_std
    """
    h = x_ref[...].astype(jnp.float32)

    # common_model: 3 x (Linear -> ReLU).  MXU matmuls, f32 accumulation,
    # elementwise work kept in f32.
    for layer in range(3):
        h = jnp.dot(h.astype(w_ref.dtype), w_ref[layer],
                    preferred_element_type=jnp.float32) + b_ref[layer]
        h = jnp.maximum(h, 0.0)

    # fused heads: one lane-dense matmul -> [mean | log_std | zeros]
    head = jnp.dot(h.astype(w_ref.dtype), w_ref[3],
                   preferred_element_type=jnp.float32) + b_ref[3]

    # clamp only the log_std columns; mean columns pass through untouched.
    col = lax.broadcasted_iota(jnp.int32, head.shape, 1)
    is_log_std = (col >= a_dim) & (col < 2 * a_dim)
    out_ref[...] = jnp.where(is_log_std,
                             jnp.clip(head, LOG_MIN, LOG_MAX),
                             head).astype(out_ref.dtype)


def pack_actor_params(raw, param_dtype=jnp.float32):
    """Pack per-layer (in,out) weights / (1,out) biases into padded slabs."""
    s_dim = raw["w1"].shape[0]
    hidden = raw["w1"].shape[1]
    a_dim = raw["wm"].shape[1]
    P = max(128, _round_up(max(s_dim, hidden, 2 * a_dim), 128))

    w_slab = jnp.zeros((_NUM_MM, P, P), param_dtype)
    b_slab = jnp.zeros((_NUM_MM, 1, P), jnp.float32)

    def put_w(slab, layer, w, col0=0):
        return slab.at[layer, :w.shape[0], col0:col0 + w.shape[1]].set(
            w.astype(param_dtype))

    def put_b(slab, layer, b, col0=0):
        return slab.at[layer, :, col0:col0 + b.shape[1]].set(
            b.astype(jnp.float32))

    w_slab = put_w(w_slab, 0, raw["w1"]); b_slab = put_b(b_slab, 0, raw["b1"])
    w_slab = put_w(w_slab, 1, raw["w2"]); b_slab = put_b(b_slab, 1, raw["b2"])
    w_slab = put_w(w_slab, 2, raw["w3"]); b_slab = put_b(b_slab, 2, raw["b3"])
    # fused head: mean in cols [0:a_dim], log_std in cols [a_dim:2*a_dim]
    w_slab = put_w(w_slab, 3, raw["wm"], 0)
    w_slab = put_w(w_slab, 3, raw["ws"], a_dim)
    b_slab = put_b(b_slab, 3, raw["bm"], 0)
    b_slab = put_b(b_slab, 3, raw["bs"], a_dim)

    return dict(w=w_slab, b=b_slab, s_dim=s_dim, hidden=hidden,
                a_dim=a_dim, P=P)


def actor_forward(x, packed, *, tile_b=256):
    """Returns (mean, log_std), both (batch, a_dim) float32."""
    P, a_dim, s_dim = packed["P"], packed["a_dim"], packed["s_dim"]
    B = x.shape[0]

    tile_b = max(8, min(_round_up(tile_b, 8), _round_up(B, 8)))
    B_pad = _round_up(B, tile_b)

    # zero-pad states to a lane-dense (B_pad, P) slab (padding contributes 0
    # through the zero-padded weight rows/cols).
    x_p = jnp.zeros((B_pad, P), jnp.float32).at[:B, :s_dim].set(
        x.astype(jnp.float32))

    grid = (B_pad // tile_b,)
    out = pl.pallas_call(
        functools.partial(_actor_kernel, a_dim=a_dim),
        out_shape=jax.ShapeDtypeStruct((B_pad, P), jnp.float32),
        grid=grid,
        in_specs=[
            pl.BlockSpec((tile_b, P), lambda i: (i, 0)),           # streamed x
            pl.BlockSpec((_NUM_MM, P, P), lambda i: (0, 0, 0)),    # resident W slab
            pl.BlockSpec((_NUM_MM, 1, P), lambda i: (0, 0, 0)),    # resident b slab
        ],
        out_specs=pl.BlockSpec((tile_b, P), lambda i: (i, 0)),
        compiler_params=pltpu.CompilerParams(
            dimension_semantics=("parallel",)),
    )(x_p, packed["w"], packed["b"])

    mean = out[:B, :a_dim]
    log_std = out[:B, a_dim:2 * a_dim]
    return mean, log_std


def init_actor_params(key, s_dim, hidden_dim, a_dim):
    """Deterministic init mimicking nn.Linear default: U(-1/sqrt(fan_in), +)."""
    def linear(key, fan_in, fan_out):
        kw, kb = jax.random.split(key)
        bound = 1.0 / jnp.sqrt(fan_in)
        w = jax.random.uniform(kw, (fan_in, fan_out), jnp.float32, -bound, bound)
        b = jax.random.uniform(kb, (1, fan_out), jnp.float32, -bound, bound)
        return w, b

    keys = jax.random.split(key, 5)
    w1, b1 = linear(keys[0], s_dim, hidden_dim)
    w2, b2 = linear(keys[1], hidden_dim, hidden_dim)
    w3, b3 = linear(keys[2], hidden_dim, hidden_dim)
    wm, bm = linear(keys[3], hidden_dim, a_dim)
    ws, bs = linear(keys[4], hidden_dim, a_dim)
    return dict(w1=w1, b1=b1, w2=w2, b2=b2, w3=w3, b3=b3,
                wm=wm, bm=bm, ws=ws, bs=bs)


def actor_forward_ref(x, p):
    """Plain-JAX reference (on the raw, unpacked params)."""
    h = jnp.maximum(x @ p["w1"] + p["b1"], 0.0)
    h = jnp.maximum(h @ p["w2"] + p["b2"], 0.0)
    h = jnp.maximum(h @ p["w3"] + p["b3"], 0.0)
    mean = h @ p["wm"] + p["bm"]
    log_std = jnp.clip(h @ p["ws"] + p["bs"], LOG_MIN, LOG_MAX)
    return mean, log_std


if __name__ == "__main__":
    # small shapes implied by the module: state dim, hidden dim, action dim
    batch, s_dim, hidden_dim, a_dim = 8, 16, 32, 4

    key = jax.random.PRNGKey(0)
    k_params, k_x, k_x2 = jax.random.split(key, 3)
    raw = init_actor_params(k_params, s_dim, hidden_dim, a_dim)
    packed = pack_actor_params(raw, param_dtype=jnp.float32)

    # --- small batch ------------------------------------------------------
    x = jax.random.normal(k_x, (batch, s_dim), jnp.float32)
    mean, log_std = jax.block_until_ready(actor_forward(x, packed))

    mean_ref, log_std_ref = actor_forward_ref(x, raw)
    assert mean.shape == (batch, a_dim) and log_std.shape == (batch, a_dim)
    assert jnp.allclose(mean, mean_ref, atol=1e-5, rtol=1e-5)
    assert jnp.allclose(log_std, log_std_ref, atol=1e-5, rtol=1e-5)
    assert float(log_std.max()) <= LOG_MAX and float(log_std.min()) >= LOG_MIN

    # --- larger batch: exercises the pipelined parallel batch grid --------
    big_b = 512
    xb = jax.random.normal(k_x2, (big_b, s_dim), jnp.float32)
    mean_b, log_std_b = jax.block_until_ready(
        actor_forward(xb, packed, tile_b=128))
    mean_b_ref, log_std_b_ref = actor_forward_ref(xb, raw)
    assert jnp.allclose(mean_b, mean_b_ref, atol=1e-5, rtol=1e-5)
    assert jnp.allclose(log_std_b, log_std_b_ref, atol=1e-5, rtol=1e-5)

    print("KERNEL_OK")
</pallas_src>

<mosaic_0001>
module attributes {stable_mosaic.version = 11 : i64} {
  func.func @_actor_kernel(%arg0: i32, %arg1: memref<8x128xf32, #tpu.memory_space<vmem>>, %arg2: memref<4x128x128xf32, #tpu.memory_space<vmem>>, %arg3: memref<4x1x128xf32, #tpu.memory_space<vmem>>, %arg4: memref<8x128xf32, #tpu.memory_space<vmem>>) attributes {dimension_semantics = [#tpu.dimension_semantics<parallel>], iteration_bounds = array<i64: 1>, scalar_prefetch = 0 : i64, scratch_operands = 0 : i64, tpu.core_type = #tpu.core_type<tc>, window_params = [{transform_indices = @transform_0, window_bounds = array<i64: 8, 128>}, {pipeline_mode = #tpu.pipeline_mode<synchronous>, transform_indices = @transform_1, window_bounds = array<i64: 4, 128, 128>}, {pipeline_mode = #tpu.pipeline_mode<synchronous>, transform_indices = @transform_2, window_bounds = array<i64: 4, 1, 128>}, {transform_indices = @transform_3, window_bounds = array<i64: 8, 128>}]} {
    %c0 = arith.constant 0 : index
    %c0_0 = arith.constant 0 : index
    %0 = vector.load %arg1[%c0, %c0_0] : memref<8x128xf32, #tpu.memory_space<vmem>>, vector<8x128xf32>
    %c0_1 = arith.constant 0 : index
    %c0_2 = arith.constant 0 : index
    %c0_3 = arith.constant 0 : index
    %1 = vector.load %arg2[%c0_1, %c0_2, %c0_3] : memref<4x128x128xf32, #tpu.memory_space<vmem>>, vector<1x128x128xf32>
    %2 = vector.shape_cast %1 : vector<1x128x128xf32> to vector<128x128xf32>
    %cst = arith.constant dense<0.000000e+00> : vector<8x128xf32>
    %3 = tpu.matmul %0, %2, %cst {dimension_numbers = #tpu.dot_dimension_numbers<[1], [0], [0], [1], [0, 0, 1, 1], [], []>} : vector<8x128xf32>, vector<128x128xf32>, vector<8x128xf32> -> vector<8x128xf32>
    %c0_4 = arith.constant 0 : index
    %c0_5 = arith.constant 0 : index
    %c0_6 = arith.constant 0 : index
    %4 = vector.load %arg3[%c0_4, %c0_5, %c0_6] : memref<4x1x128xf32, #tpu.memory_space<vmem>>, vector<1x1x128xf32>
    %5 = vector.shape_cast %4 : vector<1x1x128xf32> to vector<1x128xf32>
    %6 = vector.broadcast %5 : vector<1x128xf32> to vector<8x128xf32>
    %7 = arith.addf %3, %6 : vector<8x128xf32>
    %cst_7 = arith.constant 0.000000e+00 : f32
    %8 = vector.broadcast %cst_7 : f32 to vector<8x128xf32>
    %9 = arith.maximumf %7, %8 : vector<8x128xf32>
    %c1 = arith.constant 1 : index
    %c0_8 = arith.constant 0 : index
    %c0_9 = arith.constant 0 : index
    %10 = vector.load %arg2[%c1, %c0_8, %c0_9] : memref<4x128x128xf32, #tpu.memory_space<vmem>>, vector<1x128x128xf32>
    %11 = vector.shape_cast %10 : vector<1x128x128xf32> to vector<128x128xf32>
    %cst_10 = arith.constant dense<0.000000e+00> : vector<8x128xf32>
    %12 = tpu.matmul %9, %11, %cst_10 {dimension_numbers = #tpu.dot_dimension_numbers<[1], [0], [0], [1], [0, 0, 1, 1], [], []>} : vector<8x128xf32>, vector<128x128xf32>, vector<8x128xf32> -> vector<8x128xf32>
    %c1_11 = arith.constant 1 : index
    %c0_12 = arith.constant 0 : index
    %c0_13 = arith.constant 0 : index
    %13 = vector.load %arg3[%c1_11, %c0_12, %c0_13] : memref<4x1x128xf32, #tpu.memory_space<vmem>>, vector<1x1x128xf32>
    %14 = vector.shape_cast %13 : vector<1x1x128xf32> to vector<1x128xf32>
    %15 = vector.broadcast %14 : vector<1x128xf32> to vector<8x128xf32>
    %16 = arith.addf %12, %15 : vector<8x128xf32>
    %cst_14 = arith.constant 0.000000e+00 : f32
    %17 = vector.broadcast %cst_14 : f32 to vector<8x128xf32>
    %18 = arith.maximumf %16, %17 : vector<8x128xf32>
    %c2 = arith.constant 2 : index
    %c0_15 = arith.constant 0 : index
    %c0_16 = arith.constant 0 : index
    %19 = vector.load %arg2[%c2, %c0_15, %c0_16] : memref<4x128x128xf32, #tpu.memory_space<vmem>>, vector<1x128x128xf32>
    %20 = vector.shape_cast %19 : vector<1x128x128xf32> to vector<128x128xf32>
    %cst_17 = arith.constant dense<0.000000e+00> : vector<8x128xf32>
    %21 = tpu.matmul %18, %20, %cst_17 {dimension_numbers = #tpu.dot_dimension_numbers<[1], [0], [0], [1], [0, 0, 1, 1], [], []>} : vector<8x128xf32>, vector<128x128xf32>, vector<8x128xf32> -> vector<8x128xf32>
    %c2_18 = arith.constant 2 : index
    %c0_19 = arith.constant 0 : index
    %c0_20 = arith.constant 0 : index
    %22 = vector.load %arg3[%c2_18, %c0_19, %c0_20] : memref<4x1x128xf32, #tpu.memory_space<vmem>>, vector<1x1x128xf32>
    %23 = vector.shape_cast %22 : vector<1x1x128xf32> to vector<1x128xf32>
    %24 = vector.broadcast %23 : vector<1x128xf32> to vector<8x128xf32>
    %25 = arith.addf %21, %24 : vector<8x128xf32>
    %cst_21 = arith.constant 0.000000e+00 : f32
    %26 = vector.broadcast %cst_21 : f32 to vector<8x128xf32>
    %27 = arith.maximumf %25, %26 : vector<8x128xf32>
    %c3 = arith.constant 3 : index
    %c0_22 = arith.constant 0 : index
    %c0_23 = arith.constant 0 : index
    %28 = vector.load %arg2[%c3, %c0_22, %c0_23] : memref<4x128x128xf32, #tpu.memory_space<vmem>>, vector<1x128x128xf32>
    %29 = vector.shape_cast %28 : vector<1x128x128xf32> to vector<128x128xf32>
    %cst_24 = arith.constant dense<0.000000e+00> : vector<8x128xf32>
    %30 = tpu.matmul %27, %29, %cst_24 {dimension_numbers = #tpu.dot_dimension_numbers<[1], [0], [0], [1], [0, 0, 1, 1], [], []>} : vector<8x128xf32>, vector<128x128xf32>, vector<8x128xf32> -> vector<8x128xf32>
    %c3_25 = arith.constant 3 : index
    %c0_26 = arith.constant 0 : index
    %c0_27 = arith.constant 0 : index
    %31 = vector.load %arg3[%c3_25, %c0_26, %c0_27] : memref<4x1x128xf32, #tpu.memory_space<vmem>>, vector<1x1x128xf32>
    %32 = vector.shape_cast %31 : vector<1x1x128xf32> to vector<1x128xf32>
    %33 = vector.broadcast %32 : vector<1x128xf32> to vector<8x128xf32>
    %34 = arith.addf %30, %33 : vector<8x128xf32>
    %35 = tpu.iota {dimensions = array<i32: 1>} : vector<8x128xi32>
    %c4_i32 = arith.constant 4 : i32
    %36 = vector.broadcast %c4_i32 : i32 to vector<8x128xi32>
    %37 = arith.cmpi sge, %35, %36 : vector<8x128xi32>
    %c8_i32 = arith.constant 8 : i32
    %38 = vector.broadcast %c8_i32 : i32 to vector<8x128xi32>
    %39 = arith.cmpi slt, %35, %38 : vector<8x128xi32>
    %40 = arith.andi %37, %39 : vector<8x128xi1>
    %cst_28 = arith.constant -2.000000e+01 : f32
    %cst_29 = arith.constant 2.000000e+00 : f32
    %41 = vector.broadcast %cst_28 : f32 to vector<8x128xf32>
    %42 = arith.maximumf %41, %34 : vector<8x128xf32>
    %43 = vector.broadcast %cst_29 : f32 to vector<8x128xf32>
    %44 = arith.minimumf %43, %42 : vector<8x128xf32>
    %45 = arith.select %40, %44, %34 : vector<8x128xi1>, vector<8x128xf32>
    %c0_30 = arith.constant 0 : index
    %c0_31 = arith.constant 0 : index
    %46 = vector.load %arg4[%c0_30, %c0_31] : memref<8x128xf32, #tpu.memory_space<vmem>>, vector<8x128xf32>
    tpu.vector_store %arg4[%c0_30, %c0_31], %45 {strides = array<i32>} : memref<8x128xf32, #tpu.memory_space<vmem>>, vector<8x128xf32>,
    return
  }
  func.func @transform_0(%arg0: i32) -> (i32, i32) {
    %c0_i32 = arith.constant 0 : i32
    %c0_i32_0 = arith.constant 0 : i32
    return %arg0, %c0_i32 : i32, i32
  }
  func.func @transform_1(%arg0: i32) -> (i32, i32, i32) {
    %c0_i32 = arith.constant 0 : i32
    %c0_i32_0 = arith.constant 0 : i32
    %c0_i32_1 = arith.constant 0 : i32
    %c0_i32_2 = arith.constant 0 : i32
    return %c0_i32, %c0_i32_0, %c0_i32_1 : i32, i32, i32
  }
  func.func @transform_2(%arg0: i32) -> (i32, i32, i32) {
    %c0_i32 = arith.constant 0 : i32
    %c0_i32_0 = arith.constant 0 : i32
    %c0_i32_1 = arith.constant 0 : i32
    %c0_i32_2 = arith.constant 0 : i32
    return %c0_i32, %c0_i32_0, %c0_i32_1 : i32, i32, i32
  }
  func.func @transform_3(%arg0: i32) -> (i32, i32) {
    %c0_i32 = arith.constant 0 : i32
    %c0_i32_0 = arith.constant 0 : i32
    return %arg0, %c0_i32 : i32, i32
  }
}

</mosaic_0001>

<bundles_post_ra>
// kernel: tpu_custom_call.1
= control target key start
LH: loop header
LB: loop body
LE: loop exit
PB: predicated region body
PF: predicated region fallthrough
CT: control target
= control target key end

     0   :  { %8 = vsyncpa [#allocation3], 0  ;;  %s883_s0 = inlined_call_operand.hbm [shape: f32[8,128], index: 0, kind: input, shape index: {}]   ;;  %s884_s1 = inlined_call_operand.hbm [shape: f32[4,128,128], index: 1, kind: input, shape index: {}]   ;;  %s885_s2 = inlined_call_operand.hbm [shape: f32[4,1,128], index: 2, kind: input, shape index: {}]   ;;  %s886_s3 = inlined_call_operand.hbm [shape: f32[8,128], index: 3, kind: output, shape index: {}]  }
   0x1   :  { %9 = vsyncpa [#allocation6], 0 }
   0x2   :  { %10 = vsyncpa [#allocation4], 0  ;;  %s769_s12 = smov [#allocation5]  }
   0x3   :  { %s26_s13 = sshll.u32 %s769_s12, 4  ;;  %s27_s13 = int_to_ptr.vmem [resolvable:$true] %s26_s13 }
   0x4   :  { %s691_s14 = scalar_lea.vmem %s27_s13, 8192  ;;  %p696_p1 = scmp.lt.s32.totalorder %s27_s13, %s27_s13 }
   0x5   :  { %p692_p0 = scmp.ne.s32.totalorder %s27_s13, %s691_s14  ;;  %p697_p2 = scmp.lt.s32.totalorder %s691_s14, %s691_s14 }
   0x7   :  { %p698_p3 = por %p697_p2, %p696_p1 }
   0x9   :  { %p699_p4 = pnand %p698_p3, %p692_p0 }
   0xb   :  { %702 = shalt.err (!%p699_p4)
}
   0xc   :  { %s770_s15 = smov 128   ;;  %s771_s16 = smov 8  }
   0xd   :  { %32 = dma.hbm_to_vmem [thread:$0]  %s884_s1, 8192, %s27_s13, [#allocation6], %s770_s15, %s770_s15, %s771_s16  }
   0xe   :  { %s772_s19 = smov [#allocation2]   ;;  %s773_s21 = smov [#allocation7]  }
   0xf   :  { %s17_s20 = sshll.u32 %s772_s19, 4  ;;  %s38_s22 = sshll.u32 %s773_s21, 4  ;;  %s18_s20 = int_to_ptr.vmem [resolvable:$true] %s17_s20  ;;  %s39_s22 = int_to_ptr.vmem [resolvable:$true] %s38_s22 }
  0x10   :  { %s711_s23 = scalar_lea.vmem %s18_s20, 128  ;;  %p716_p6 = scmp.lt.s32.totalorder %s18_s20, %s18_s20 }
  0x11   :  { %p712_p5 = scmp.ne.s32.totalorder %s18_s20, %s711_s23  ;;  %p717_p7 = scmp.lt.s32.totalorder %s711_s23, %s711_s23 }
  0x13   :  { %p718_p8 = por %p717_p7, %p716_p6 }
  0x15   :  { %p719_p9 = pnand %p718_p8, %p712_p5 }
  0x17   :  { %722 = shalt.err (!%p719_p9)
}
  0x18   :  { %20 = dma.hbm_to_vmem [thread:$0]  %s883_s0, 128, %s18_s20, [#allocation3]  }
  0x19   :  { %s731_s26 = scalar_lea.vmem %s39_s22, 64  ;;  %p736_p11 = scmp.lt.s32.totalorder %s39_s22, %s39_s22 }
  0x1a   :  { %p732_p10 = scmp.ne.s32.totalorder %s39_s22, %s731_s26  ;;  %p737_p12 = scmp.lt.s32.totalorder %s731_s26, %s731_s26 }
  0x1c   :  { %p738_p13 = por %p737_p12, %p736_p11 }
  0x1e   :  { %p739_p0 = pnand %p738_p13, %p732_p10 }
  0x20   :  { %742 = shalt.err (!%p739_p0)
}
  0x21   :  { %s774_s1 = smov 16   ;;  %s775_s27 = smov 1  }
  0x22   :  { %44 = dma.hbm_to_vmem [thread:$0]  %s885_s2, 64, %s39_s22, [#allocation6], %s774_s1, %s774_s1, %s775_s27  }
  0x23   :  { %763 = dma.done.wait [#allocation3], 128  }
  0x24   :  { %764 = vsyncadd [#allocation3], 4294967168 }
  0x25   :  { %765 = dma.done.wait [#allocation6], 8256  }
  0x26   :  { %766 = vsyncadd [#allocation6], 4294959040  ;;  %v776_v0 = vmov 0.0   ;;  %vm777_vm0 = vmmov 0   ;;  %v70_v1 = vld [vmem:[#allocation5 + $0x78] sm:$0xff]  ;;  %v69_v2 = vld [vmem:[#allocation5 + $0x70] sm:$0xff] }
  0x27   :  { %533 = vmatprep.subr.mxu0 %v776_v0  ;;  %565 = vmatprep.mubr.msk.f32.mxu0 %vm777_vm0, %v776_v0  ;;  %v68_v3 = vld [vmem:[#allocation5 + $0x68] sm:$0xff]  ;;  %v67_v4 = vld [vmem:[#allocation5 + $0x60] sm:$0xff]  ;;  %v165_v5 = vld [vmem:[#allocation5 + $0xf8] sm:$0xff]  ;;  %s778_s0 = smov [#allocation8]  }
  0x28   :  { %568 = vmatprep.subr.mxu1 %v776_v0  ;;  %600 = vmatprep.mubr.msk.f32.mxu1 %vm777_vm0, %v776_v0  ;;  %v66_v6 = vld [vmem:[#allocation5 + $0x58] sm:$0xff]  ;;  %v164_v7 = vld [vmem:[#allocation5 + $0xf0] sm:$0xff]  ;;  %v163_v8 = vld [vmem:[#allocation5 + $0xe8] sm:$0xff]  ;;  %s451_s2 = sshll.u32 %s778_s0, 4  ;;  %s452_s2 = int_to_ptr.vmem [resolvable:$true] %s451_s2 }
  0x29   :  { %534 = vmatpush3.msra.mxu0 %v70_v1  ;;  %569 = vmatpush3.msra.mxu1 %v165_v5  ;;  %v65_v9 = vld [vmem:[#allocation5 + $0x50] sm:$0xff]  ;;  %v162_v10 = vld [vmem:[#allocation5 + $0xe0] sm:$0xff]  ;;  %v64_v11 = vld [vmem:[#allocation5 + $0x48] sm:$0xff]  ;;  %s743_s30 = scalar_lea.vmem %s452_s2, 128  ;;  %p748_p2 = scmp.lt.s32.totalorder %s452_s2, %s452_s2 }
  0x2a   :  { %535 = vmatprep.subr.mxu0 %v776_v0  ;;  %570 = vmatprep.subr.mxu1 %v776_v0  ;;  %v161_v12 = vld [vmem:[#allocation5 + $0xd8] sm:$0xff]  ;;  %v63_v13 = vld [vmem:[#allocation5 + $0x40] sm:$0xff]  ;;  %v160_v14 = vld [vmem:[#allocation5 + $0xd0] sm:$0xff]  ;;  %p744_p1 = scmp.ne.s32.totalorder %s452_s2, %s743_s30  ;;  %p749_p3 = scmp.lt.s32.totalorder %s743_s30, %s743_s30 }
  0x2b   :  { %536 = vmatpush3.msra.mxu0 %v69_v2  ;;  %571 = vmatpush3.msra.mxu1 %v164_v7  ;;  %v62_v15 = vld [vmem:[#allocation5 + $0x38] sm:$0xff]  ;;  %v159_v16 = vld [vmem:[#allocation5 + $0xc8] sm:$0xff]  ;;  %v61_v17 = vld [vmem:[#allocation5 + $0x30] sm:$0xff] }
  0x2c   :  { %537 = vmatprep.subr.mxu0 %v776_v0  ;;  %572 = vmatprep.subr.mxu1 %v776_v0  ;;  %v158_v18 = vld [vmem:[#allocation5 + $0xc0] sm:$0xff]  ;;  %v60_v19 = vld [vmem:[#allocation5 + $0x28] sm:$0xff]  ;;  %v157_v20 = vld [vmem:[#allocation5 + $0xb8] sm:$0xff]  ;;  %p750_p4 = por %p749_p3, %p748_p2 }
  0x2d   :  { %538 = vmatpush3.msra.mxu0 %v68_v3  ;;  %573 = vmatpush3.msra.mxu1 %v163_v8  ;;  %v59_v21 = vld [vmem:[#allocation5 + $0x20] sm:$0xff]  ;;  %v156_v22 = vld [vmem:[#allocation5 + $0xb0] sm:$0xff]  ;;  %v58_v23 = vld [vmem:[#allocation5 + $0x18] sm:$0xff] }
  0x2e   :  { %539 = vmatprep.subr.mxu0 %v776_v0  ;;  %574 = vmatprep.subr.mxu1 %v776_v0  ;;  %v155_v24 = vld [vmem:[#allocation5 + $0xa8] sm:$0xff]  ;;  %v57_v25 = vld [vmem:[#allocation5 + $0x10] sm:$0xff]  ;;  %v154_v26 = vld [vmem:[#allocation5 + $0xa0] sm:$0xff]  ;;  %p751_p5 = pnand %p750_p4, %p744_p1 }
  0x2f   :  { %540 = vmatpush3.msra.mxu0 %v67_v4  ;;  %575 = vmatpush3.msra.mxu1 %v162_v10  ;;  %v56_v27 = vld [vmem:[#allocation5 + $0x8] sm:$0xff]  ;;  %v153_v28 = vld [vmem:[#allocation5 + $0x98] sm:$0xff]  ;;  %v55_v29 = vld [vmem:[#allocation5] sm:$0xff] }
  0x30   :  { %541 = vmatprep.subr.mxu0 %v776_v0  ;;  %576 = vmatprep.subr.mxu1 %v776_v0  ;;  %v54_v30 = vld [vmem:[#allocation2] sm:$0xff]  ;;  %v152_v31 = vld [vmem:[#allocation5 + $0x90] sm:$0xff]  ;;  %v151_v32 = vld [vmem:[#allocation5 + $0x88] sm:$0xff] }
  0x31   :  { %542 = vmatpush3.msra.mxu0 %v66_v6  ;;  %577 = vmatpush3.msra.mxu1 %v161_v12  ;;  %v150_v33 = vld [vmem:[#allocation5 + $0x80] sm:$0xff]  ;;  %v261_v34 = vld [vmem:[#allocation5 + $0x178] sm:$0xff]  ;;  %v260_v35 = vld [vmem:[#allocation5 + $0x170] sm:$0xff] }
  0x32   :  { %543 = vmatprep.subr.mxu0 %v776_v0  ;;  %578 = vmatprep.subr.mxu1 %v776_v0  ;;  %v259_v36 = vld [vmem:[#allocation5 + $0x168] sm:$0xff]  ;;  %v258_v37 = vld [vmem:[#allocation5 + $0x160] sm:$0xff]  ;;  %v257_v38 = vld [vmem:[#allocation5 + $0x158] sm:$0xff] }
  0x33   :  { %544 = vmatpush3.msra.mxu0 %v65_v9  ;;  %579 = vmatpush3.msra.mxu1 %v160_v14  ;;  %v256_v39 = vld [vmem:[#allocation5 + $0x150] sm:$0xff]  ;;  %v255_v40 = vld [vmem:[#allocation5 + $0x148] sm:$0xff]  ;;  %v254_v41 = vld [vmem:[#allocation5 + $0x140] sm:$0xff] }
  0x34   :  { %545 = vmatprep.subr.mxu0 %v776_v0  ;;  %580 = vmatprep.subr.mxu1 %v776_v0  ;;  %v253_v42 = vld [vmem:[#allocation5 + $0x138] sm:$0xff]  ;;  %v252_v43 = vld [vmem:[#allocation5 + $0x130] sm:$0xff]  ;;  %v251_v44 = vld [vmem:[#allocation5 + $0x128] sm:$0xff] }
  0x35   :  { %546 = vmatpush3.msra.mxu0 %v64_v11  ;;  %581 = vmatpush3.msra.mxu1 %v159_v16  ;;  %v250_v45 = vld [vmem:[#allocation5 + $0x120] sm:$0xff]  ;;  %v249_v46 = vld [vmem:[#allocation5 + $0x118] sm:$0xff]  ;;  %v248_v52 = vld [vmem:[#allocation5 + $0x110] sm:$0xff] }
  0x36   :  { %547 = vmatprep.subr.mxu0 %v776_v0  ;;  %582 = vmatprep.subr.mxu1 %v776_v0  ;;  %v461_v47 = vld [vmem:[#allocation7] ss:$0 sm:$0xff]  ;;  %v247_v53 = vld [vmem:[#allocation5 + $0x108] sm:$0xff]  ;;  %v357_v55 = vld [vmem:[#allocation5 + $0x1f8] sm:$0xff] }
  0x37   :  { %548 = vmatpush3.msra.mxu0 %v63_v13  ;;  %583 = vmatpush3.msra.mxu1 %v158_v18  ;;  %v246_v54 = vld [vmem:[#allocation5 + $0x100] sm:$0xff]  ;;  %v356_v56 = vld [vmem:[#allocation5 + $0x1f0] sm:$0xff]  ;;  %v355_v57 = vld [vmem:[#allocation5 + $0x1e8] sm:$0xff]  ;;  %v436_v18 = vlaneseq }
  0x38   :  { %549 = vmatprep.subr.mxu0 %v776_v0  ;;  %584 = vmatprep.subr.mxu1 %v776_v0  ;;  %v354_v58 = vld [vmem:[#allocation5 + $0x1e0] sm:$0xff]  ;;  %v353_v59 = vld [vmem:[#allocation5 + $0x1d8] sm:$0xff]  ;;  %v352_v60 = vld [vmem:[#allocation5 + $0x1d0] sm:$0xff] }
  0x39   :  { %550 = vmatpush3.msra.mxu0 %v62_v15  ;;  %585 = vmatpush3.msra.mxu1 %v157_v20  ;;  %v351_v61 = vld [vmem:[#allocation5 + $0x1c8] sm:$0xff]  ;;  %v350_v62 = vld [vmem:[#allocation5 + $0x1c0] sm:$0xff]  ;;  %v349_v63 = vld [vmem:[#allocation5 + $0x1b8] sm:$0xff] }
  0x3a   :  { %551 = vmatprep.subr.mxu0 %v776_v0  ;;  %586 = vmatprep.subr.mxu1 %v776_v0  ;;  %v348_v1 = vld [vmem:[#allocation5 + $0x1b0] sm:$0xff]  ;;  %v347_v2 = vld [vmem:[#allocation5 + $0x1a8] sm:$0xff]  ;;  %v346_v3 = vld [vmem:[#allocation5 + $0x1a0] sm:$0xff] }
  0x3b   :  { %552 = vmatpush3.msra.mxu0 %v61_v17  ;;  %587 = vmatpush3.msra.mxu1 %v156_v22  ;;  %v345_v4 = vld [vmem:[#allocation5 + $0x198] sm:$0xff]  ;;  %v462_v5 = vld [vmem:[#allocation7 + $0x1] ss:$0 sm:$0xff]  ;;  %v344_v10 = vld [vmem:[#allocation5 + $0x190] sm:$0xff] }
  0x3c   :  { %553 = vmatprep.subr.mxu0 %v776_v0  ;;  %588 = vmatprep.subr.mxu1 %v776_v0  ;;  %v343_v11 = vld [vmem:[#allocation5 + $0x188] sm:$0xff]  ;;  %v342_v12 = vld [vmem:[#allocation5 + $0x180] sm:$0xff] }
  0x3d   :  { %554 = vmatpush3.msra.mxu0 %v60_v19  ;;  %589 = vmatpush3.msra.mxu1 %v155_v24  ;;  %v463_v13 = vld [vmem:[#allocation7 + $0x2] ss:$0 sm:$0xff]  ;;  %v437_v19 = vand.u32 127, %v436_v18  ;;  %v464_v20 = vld [vmem:[#allocation7 + $0x3] ss:$0 sm:$0xff] }
  0x3e   :  { %555 = vmatprep.subr.mxu0 %v776_v0  ;;  %590 = vmatprep.subr.mxu1 %v776_v0 }
  0x3f   :  { %556 = vmatpush3.msra.mxu0 %v59_v21  ;;  %591 = vmatpush3.msra.mxu1 %v154_v26  ;;  %vm438_vm1 = vcmp.ge.s32.totalorder %v437_v19, 4  ;;  %vm439_vm2 = vcmp.lt.s32.totalorder %v437_v19, 8 }
  0x40   :  { %557 = vmatprep.subr.mxu0 %v776_v0  ;;  %592 = vmatprep.subr.mxu1 %v776_v0  ;;  %vm440_vm3 = vmand %vm438_vm1, %vm439_vm2 }
  0x41   :  { %558 = vmatpush3.msra.mxu0 %v58_v23  ;;  %593 = vmatpush3.msra.mxu1 %v153_v28 }
  0x42   :  { %559 = vmatprep.subr.mxu0 %v776_v0  ;;  %594 = vmatprep.subr.mxu1 %v776_v0 }
  0x43   :  { %560 = vmatpush3.msra.mxu0 %v57_v25  ;;  %595 = vmatpush3.msra.mxu1 %v152_v31 }
  0x44   :  { %561 = vmatprep.subr.mxu0 %v776_v0  ;;  %596 = vmatprep.subr.mxu1 %v776_v0 }
  0x45   :  { %562 = vmatpush3.msra.mxu0 %v56_v27  ;;  %597 = vmatpush3.msra.mxu1 %v151_v32 }
  0x46   :  { %563 = vmatprep.subr.mxu0 %v776_v0  ;;  %598 = vmatprep.subr.mxu1 %v776_v0 }
  0x47   :  { %564 = vmatpush3.msra.mxu0 %v55_v29  ;;  %599 = vmatpush3.msra.mxu1 %v150_v33 }
  0x48   :  { %566 = vmatmul.mubr.f32.vlgmr.msra.gmra.mxu0 %v54_v30  ;;  %603 = vmatprep.subr.mxu0 %v776_v0 }
  0x49   :  { %635 = vmatprep.mubr.msk.f32.mxu0 %vm777_vm0, %v776_v0  ;;  %638 = vmatprep.subr.mxu1 %v776_v0 }
  0x4a   :  { %604 = vmatpush3.msra.mxu0 %v261_v34 }
  0x4b   :  { %605 = vmatprep.subr.mxu0 %v776_v0 }
  0x4c   :  { %606 = vmatpush3.msra.mxu0 %v260_v35 }
  0x4d   :  { %607 = vmatprep.subr.mxu0 %v776_v0 }
  0x4e   :  { %608 = vmatpush3.msra.mxu0 %v259_v36 }
  0x4f   :  { %609 = vmatprep.subr.mxu0 %v776_v0 }
  0x50   :  { %610 = vmatpush3.msra.mxu0 %v258_v37 }
  0x51   :  { %611 = vmatprep.subr.mxu0 %v776_v0 }
  0x52   :  { %612 = vmatpush3.msra.mxu0 %v257_v38 }
  0x53   :  { %613 = vmatprep.subr.mxu0 %v776_v0 }
  0x54   :  { %614 = vmatpush3.msra.mxu0 %v256_v39 }
  0x55   :  { %615 = vmatprep.subr.mxu0 %v776_v0 }
  0x56   :  { %616 = vmatpush3.msra.mxu0 %v255_v40 }
  0x57   :  { %617 = vmatprep.subr.mxu0 %v776_v0 }
  0x58   :  { %618 = vmatpush3.msra.mxu0 %v254_v41 }
  0x59   :  { %619 = vmatprep.subr.mxu0 %v776_v0 }
  0x5a   :  { %620 = vmatpush3.msra.mxu0 %v253_v42 }
  0x5b   :  { %621 = vmatprep.subr.mxu0 %v776_v0 }
  0x5c   :  { %622 = vmatpush3.msra.mxu0 %v252_v43 }
  0x5d   :  { %623 = vmatprep.subr.mxu0 %v776_v0 }
  0x5e   :  { %624 = vmatpush3.msra.mxu0 %v251_v44 }
  0x5f   :  { %625 = vmatprep.subr.mxu0 %v776_v0 }
  0x60   :  { %626 = vmatpush3.msra.mxu0 %v250_v45 }
  0x61   :  { %627 = vmatprep.subr.mxu0 %v776_v0 }
  0x62   :  { %628 = vmatpush3.msra.mxu0 %v249_v46 }
  0x63   :  { %629 = vmatprep.subr.mxu0 %v776_v0 }
  0x64   :  { %630 = vmatpush3.msra.mxu0 %v248_v52 }
  0x65   :  { %631 = vmatprep.subr.mxu0 %v776_v0 }
  0x66   :  { %632 = vmatpush3.msra.mxu0 %v247_v53 }
  0x67   :  { %633 = vmatprep.subr.mxu0 %v776_v0 }
  0x68   :  { %634 = vmatpush3.msra.mxu0 %v246_v54 }
 0x108   :  { %v144_v48 = vpop.f32.mrf.mxu0 }
 0x109   :  { %v145_v49 = vadd.f32 %v461_v47, %v144_v48 }
 0x10a   :  { %v567_v50 = vpop.f32.mrf.mxu0 }
 0x10b   :  { %v148_v51 = vmax.f32 %v145_v49, 0.0 }
 0x10d   :  { %601 = vmatmul.mubr.f32.vlgmr.msra.gmra.mxu1 %v148_v51 }
 0x10e   :  { %670 = vmatprep.mubr.msk.f32.mxu1 %vm777_vm0, %v776_v0  ;;  %639 = vmatpush3.msra.mxu1 %v357_v55 }
 0x10f   :  { %640 = vmatprep.subr.mxu1 %v776_v0 }
 0x110   :  { %641 = vmatpush3.msra.mxu1 %v356_v56 }
 0x111   :  { %642 = vmatprep.subr.mxu1 %v776_v0 }
 0x112   :  { %643 = vmatpush3.msra.mxu1 %v355_v57 }
 0x113   :  { %644 = vmatprep.subr.mxu1 %v776_v0 }
 0x114   :  { %645 = vmatpush3.msra.mxu1 %v354_v58 }
 0x115   :  { %646 = vmatprep.subr.mxu1 %v776_v0 }
 0x116   :  { %647 = vmatpush3.msra.mxu1 %v353_v59 }
 0x117   :  { %648 = vmatprep.subr.mxu1 %v776_v0 }
 0x118   :  { %649 = vmatpush3.msra.mxu1 %v352_v60 }
 0x119   :  { %650 = vmatprep.subr.mxu1 %v776_v0 }
 0x11a   :  { %651 = vmatpush3.msra.mxu1 %v351_v61 }
 0x11b   :  { %652 = vmatprep.subr.mxu1 %v776_v0 }
 0x11c   :  { %653 = vmatpush3.msra.mxu1 %v350_v62 }
 0x11d   :  { %654 = vmatprep.subr.mxu1 %v776_v0 }
 0x11e   :  { %655 = vmatpush3.msra.mxu1 %v349_v63 }
 0x11f   :  { %656 = vmatprep.subr.mxu1 %v776_v0 }
 0x120   :  { %657 = vmatpush3.msra.mxu1 %v348_v1 }
 0x121   :  { %658 = vmatprep.subr.mxu1 %v776_v0 }
 0x122   :  { %659 = vmatpush3.msra.mxu1 %v347_v2 }
 0x123   :  { %660 = vmatprep.subr.mxu1 %v776_v0 }
 0x124   :  { %661 = vmatpush3.msra.mxu1 %v346_v3 }
 0x125   :  { %662 = vmatprep.subr.mxu1 %v776_v0 }
 0x126   :  { %663 = vmatpush3.msra.mxu1 %v345_v4 }
 0x127   :  { %664 = vmatprep.subr.mxu1 %v776_v0 }
 0x128   :  { %665 = vmatpush3.msra.mxu1 %v344_v10 }
 0x129   :  { %666 = vmatprep.subr.mxu1 %v776_v0 }
 0x12a   :  { %667 = vmatpush3.msra.mxu1 %v343_v11 }
 0x12b   :  { %668 = vmatprep.subr.mxu1 %v776_v0 }
 0x12c   :  { %669 = vmatpush3.msra.mxu1 %v342_v12 }
 0x1cd   :  { %v240_v6 = vpop.f32.mrf.mxu1 }
 0x1ce   :  { %v241_v7 = vadd.f32 %v462_v5, %v240_v6 }
 0x1cf   :  { %v602_v8 = vpop.f32.mrf.mxu1 }
 0x1d0   :  { %v244_v9 = vmax.f32 %v241_v7, 0.0 }
 0x1d2   :  { %636 = vmatmul.mubr.f32.vlgmr.msra.gmra.mxu0 %v244_v9 }
 0x292   :  { %v336_v14 = vpop.f32.mrf.mxu0 }
 0x293   :  { %v337_v15 = vadd.f32 %v463_v13, %v336_v14 }
 0x294   :  { %v637_v16 = vpop.f32.mrf.mxu0 }
 0x295   :  { %v340_v17 = vmax.f32 %v337_v15, 0.0 }
 0x297   :  { %671 = vmatmul.mubr.f32.vlgmr.msra.gmra.mxu1 %v340_v17 }
 0x357   :  { %v432_v21 = vpop.f32.mrf.mxu1 }
 0x358   :  { %v433_v22 = vadd.f32 %v464_v20, %v432_v21 }
 0x359   :  { %v672_v23 = vpop.f32.mrf.mxu1 }
 0x35a   :  { %v441_v24 = vmax.f32 %v433_v22, -20.0 }
 0x35c   :  { %v442_v0 = vmin.f32 %v441_v24, 2.0 }
 0x35e   :  { %v443_v25 = vsel %vm440_vm3, %v442_v0, %v433_v22 }
 0x35f   :  { %444 = vst [vmem:[#allocation8] sm:$0xff] %v443_v25 }
 0x360   :  { %754 = shalt.err (!%p751_p5)
}
 0x361   :  { %454 = dma.vmem_to_hbm [thread:$0]  %s452_s2, 128, %s886_s3, [#allocation4]  }
 0x362   :  { %767 = dma.done.wait [#allocation4], 128  }
 0x363   :  { %768 = vsyncadd [#allocation4], 4294967168 }
 0x364   :  { %458 = vsyncpa [#allocation3], 1 }
 0x365   :  { %459 = vsyncpa [#allocation6], 1 }
 0x366   :  { %460 = vsyncpa [#allocation4], 1 }

</bundles_post_ra>
